<compile_context>
chip_gen: v7x
topology: tpu7x:2x2x1
jax: 0.10.0
libtpu: 0.0.40
codegen_flags: <defaults>
</compile_context>

<pallas_src>
import jax
import jax.numpy as jnp
from jax.experimental import pallas as pl
from jax.experimental.pallas import tpu as pltpu


def _round_up(a, b):
    return (a + b - 1) // b * b


def _pick_batch_tile(B, C, hw_tile, itemsize, max_block_bytes=4 * 1024 * 1024):
    # The (bt, C) attention output block must satisfy the (8, 128) rule on its
    # second-minor dim: bt == B (full dim) or bt % 8 == 0.
    cands = [d for d in range(1, B + 1) if B % d == 0 and (d == B or d % 8 == 0)]
    fitting = [d for d in cands if d * C * hw_tile * itemsize <= max_block_bytes]
    return max(fitting) if fitting else min(cands)


def eca_attention(x, conv_w, conv_b):
    """ECA forward. x: [B, C, H, W]; conv_w: [3]; conv_b: []."""
    B, C, H, W = x.shape
    HW = H * W
    lane = 128

    hw_tile = min(512, _round_up(HW, lane))
    HWp = _round_up(HW, hw_tile)
    bt = _pick_batch_tile(B, C, hw_tile, x.dtype.itemsize)
    n_b = B // bt
    n_hw = HWp // hw_tile

    x_flat = x.reshape(B, C, HW)
    if HWp != HW:
        # zero padding: contributes nothing to the sum, sliced off at the end
        x_flat = jnp.pad(x_flat, ((0, 0), (0, 0), (0, HWp - HW)))

    w_smem = conv_w.reshape(3).astype(jnp.float32)
    b_smem = conv_b.reshape(1).astype(jnp.float32)
    inv_hw = 1.0 / float(HW)

    # ---- pass 1: global average pool + 3-tap channel conv + sigmoid --------
    def gap_conv_kernel(w_ref, b_ref, x_ref, attn_ref, acc_ref):
        t = pl.program_id(1)

        @pl.when(t == 0)
        def _init():
            acc_ref[...] = jnp.zeros_like(acc_ref)

        xt = x_ref[...].astype(jnp.float32)          # (bt, C, hw_tile)
        acc_ref[...] += jnp.sum(xt, axis=2)          # lane-major (bt, C)

        @pl.when(t == pl.num_programs(1) - 1)
        def _finalize():
            gap = acc_ref[...] * inv_hw              # (bt, C)
            w0 = w_ref[0]
            w1 = w_ref[1]
            w2 = w_ref[2]
            bias = b_ref[0]
            # Tridiagonal band so that
            #   y[:, c] = w0*gap[:, c-1] + w1*gap[:, c] + w2*gap[:, c+1]
            # with zero padding at the channel boundaries (== Conv1d pad=1).
            src = jax.lax.broadcasted_iota(jnp.int32, (C, C), 0)
            dst = jax.lax.broadcasted_iota(jnp.int32, (C, C), 1)
            band = (w0 * (src == dst - 1).astype(jnp.float32)
                    + w1 * (src == dst).astype(jnp.float32)
                    + w2 * (src == dst + 1).astype(jnp.float32))
            y = jnp.dot(gap, band,
                        precision=jax.lax.Precision.HIGHEST,
                        preferred_element_type=jnp.float32) + bias
            attn_ref[...] = jax.nn.sigmoid(y)

    attn = pl.pallas_call(
        gap_conv_kernel,
        out_shape=jax.ShapeDtypeStruct((B, C), jnp.float32),
        grid_spec=pltpu.PrefetchScalarGridSpec(
            num_scalar_prefetch=0,
            grid=(n_b, n_hw),
            in_specs=[
                pl.BlockSpec(memory_space=pltpu.MemorySpace.SMEM),   # conv_w
                pl.BlockSpec(memory_space=pltpu.MemorySpace.SMEM),   # conv_b
                pl.BlockSpec((bt, C, hw_tile), lambda b, t: (b, 0, t)),
            ],
            out_specs=pl.BlockSpec((bt, C), lambda b, t: (b, 0)),
            scratch_shapes=[pltpu.VMEM((bt, C), jnp.float32)],
        ),
        compiler_params=pltpu.CompilerParams(
            dimension_semantics=("parallel", "arbitrary")),
    )(w_smem, b_smem, x_flat)

    # ---- pass 2: channel-wise rescale over lane-dense HW tiles --------------
    def scale_kernel(x_ref, a_ref, o_ref):
        # x: (bt, C, hw_tile); a: (bt, C, 1) broadcast over the lane axis.
        o_ref[...] = (x_ref[...] * a_ref[...]).astype(o_ref.dtype)

    attn_col = attn.reshape(B, C, 1)   # free HBM reshape; DMA'd as a column

    out_flat = pl.pallas_call(
        scale_kernel,
        out_shape=jax.ShapeDtypeStruct((B, C, HWp), x.dtype),
        grid_spec=pltpu.PrefetchScalarGridSpec(
            num_scalar_prefetch=0,
            grid=(n_b, n_hw),
            in_specs=[
                pl.BlockSpec((bt, C, hw_tile), lambda b, t: (b, 0, t)),
                pl.BlockSpec((bt, C, 1), lambda b, t: (b, 0, 0)),
            ],
            out_specs=pl.BlockSpec((bt, C, hw_tile), lambda b, t: (b, 0, t)),
        ),
        compiler_params=pltpu.CompilerParams(
            dimension_semantics=("parallel", "parallel")),
    )(x_flat, attn_col)

    if HWp != HW:
        out_flat = out_flat[:, :, :HW]
    return out_flat.reshape(B, C, H, W)


def eca_reference(x, conv_w, conv_b):
    """Pure-JAX reference mirroring the PyTorch forward."""
    gap = jnp.mean(x, axis=(2, 3))                        # [B, C]
    gp = jnp.pad(gap, ((0, 0), (1, 1)))                   # zero pad channels
    y = (conv_w[0] * gp[:, :-2]
         + conv_w[1] * gp[:, 1:-1]
         + conv_w[2] * gp[:, 2:]
         + conv_b)                                        # [B, C]
    attn = jax.nn.sigmoid(y)[:, :, None, None]            # [B, C, 1, 1]
    return x * attn


if __name__ == "__main__":
    key = jax.random.PRNGKey(0)
    kx, kw, kb = jax.random.split(key, 3)

    B, C, H, W = 2, 4, 16, 16
    x = jax.random.normal(kx, (B, C, H, W), dtype=jnp.float32)

    # Conv1d(1, 1, kernel_size=3, padding=1) parameters (weight [1,1,3] -> [3]).
    conv_w = jax.random.normal(kw, (3,), dtype=jnp.float32) * 0.5
    conv_b = jax.random.normal(kb, (), dtype=jnp.float32) * 0.1

    out = eca_attention(x, conv_w, conv_b)
    out = jax.block_until_ready(out)

    ref = eca_reference(x, conv_w, conv_b)
    assert out.shape == x.shape
    assert jnp.allclose(out, ref, atol=1e-4, rtol=1e-4), "mismatch vs reference"

    print("KERNEL_OK")
</pallas_src>

<mosaic_0001>
module attributes {stable_mosaic.version = 11 : i64} {
  func.func @gap_conv_kernel(%arg0: i32, %arg1: i32, %arg2: memref<3xf32, #tpu.memory_space<smem>>, %arg3: memref<1xf32, #tpu.memory_space<smem>>, %arg4: memref<2x4x256xf32, #tpu.memory_space<vmem>>, %arg5: memref<2x4xf32, #tpu.memory_space<vmem>>, %arg6: memref<2x4xf32, #tpu.memory_space<vmem>>) attributes {dimension_semantics = [#tpu.dimension_semantics<parallel>, #tpu.dimension_semantics<arbitrary>], iteration_bounds = array<i64: 1, 1>, scalar_prefetch = 0 : i64, scratch_operands = 1 : i64, tpu.core_type = #tpu.core_type<tc>, window_params = [{transform_indices = @transform_0, window_bounds = array<i64: 3>}, {transform_indices = @transform_1, window_bounds = array<i64: 1>}, {transform_indices = @transform_2, window_bounds = array<i64: 2, 4, 256>}, {transform_indices = @transform_3, window_bounds = array<i64: 2, 4>}]} {
    %c0_i32 = arith.constant 0 : i32
    %0 = arith.cmpi eq, %arg1, %c0_i32 : i32
    %1 = arith.extui %0 : i1 to i32
    %c0_i32_0 = arith.constant 0 : i32
    %2 = arith.cmpi ne, %1, %c0_i32_0 : i32
    scf.if %2 {
      %cst_9 = arith.constant 0.000000e+00 : f32
      %11 = vector.broadcast %cst_9 : f32 to vector<2x4xf32>
      %c0_10 = arith.constant 0 : index
      %c0_11 = arith.constant 0 : index
      %12 = vector.load %arg6[%c0_10, %c0_11] : memref<2x4xf32, #tpu.memory_space<vmem>>, vector<2x4xf32>
      tpu.vector_store %arg6[%c0_10, %c0_11], %11 {strides = array<i32>} : memref<2x4xf32, #tpu.memory_space<vmem>>, vector<2x4xf32>,
    } else {
    }
    %c0 = arith.constant 0 : index
    %c0_1 = arith.constant 0 : index
    %c0_2 = arith.constant 0 : index
    %3 = vector.load %arg4[%c0, %c0_1, %c0_2] : memref<2x4x256xf32, #tpu.memory_space<vmem>>, vector<2x4x256xf32>
    %c0_3 = arith.constant 0 : index
    %c0_4 = arith.constant 0 : index
    %4 = vector.load %arg6[%c0_3, %c0_4] : memref<2x4xf32, #tpu.memory_space<vmem>>, vector<2x4xf32>
    %cst = arith.constant dense<0.000000e+00> : vector<2x4xf32>
    %5 = vector.multi_reduction <add>, %3, %cst [2] : vector<2x4x256xf32> to vector<2x4xf32>
    %6 = arith.addf %4, %5 : vector<2x4xf32>
    %c0_5 = arith.constant 0 : index
    %c0_6 = arith.constant 0 : index
    %7 = vector.load %arg6[%c0_5, %c0_6] : memref<2x4xf32, #tpu.memory_space<vmem>>, vector<2x4xf32>
    tpu.vector_store %arg6[%c0_5, %c0_6], %6 {strides = array<i32>} : memref<2x4xf32, #tpu.memory_space<vmem>>, vector<2x4xf32>,
    %c0_i32_7 = arith.constant 0 : i32
    %8 = arith.cmpi eq, %arg1, %c0_i32_7 : i32
    %9 = arith.extui %8 : i1 to i32
    %c0_i32_8 = arith.constant 0 : i32
    %10 = arith.cmpi ne, %9, %c0_i32_8 : i32
    scf.if %10 {
      %c0_9 = arith.constant 0 : index
      %c0_10 = arith.constant 0 : index
      %11 = vector.load %arg6[%c0_9, %c0_10] : memref<2x4xf32, #tpu.memory_space<vmem>>, vector<2x4xf32>
      %cst_11 = arith.constant 3.906250e-03 : f32
      %12 = vector.broadcast %cst_11 : f32 to vector<2x4xf32>
      %13 = arith.mulf %11, %12 : vector<2x4xf32>
      %c0_12 = arith.constant 0 : index
      %14 = memref.load %arg2[%c0_12] : memref<3xf32, #tpu.memory_space<smem>>
      %c1 = arith.constant 1 : index
      %15 = memref.load %arg2[%c1] : memref<3xf32, #tpu.memory_space<smem>>
      %c2 = arith.constant 2 : index
      %16 = memref.load %arg2[%c2] : memref<3xf32, #tpu.memory_space<smem>>
      %c0_13 = arith.constant 0 : index
      %17 = memref.load %arg3[%c0_13] : memref<1xf32, #tpu.memory_space<smem>>
      %18 = tpu.iota {dimensions = array<i32: 0>} : vector<4x4xi32>
      %19 = tpu.iota {dimensions = array<i32: 1>} : vector<4x4xi32>
      %c1_i32 = arith.constant 1 : i32
      %20 = vector.broadcast %c1_i32 : i32 to vector<4x4xi32>
      %21 = arith.subi %19, %20 : vector<4x4xi32>
      %22 = arith.cmpi eq, %18, %21 : vector<4x4xi32>
      %23 = arith.extui %22 : vector<4x4xi1> to vector<4x4xi32>
      %24 = arith.sitofp %23 : vector<4x4xi32> to vector<4x4xf32>
      %25 = vector.broadcast %14 : f32 to vector<4x4xf32>
      %26 = arith.mulf %25, %24 : vector<4x4xf32>
      %27 = arith.cmpi eq, %18, %19 : vector<4x4xi32>
      %28 = arith.extui %27 : vector<4x4xi1> to vector<4x4xi32>
      %29 = arith.sitofp %28 : vector<4x4xi32> to vector<4x4xf32>
      %30 = vector.broadcast %15 : f32 to vector<4x4xf32>
      %31 = arith.mulf %30, %29 : vector<4x4xf32>
      %32 = arith.addf %26, %31 : vector<4x4xf32>
      %c1_i32_14 = arith.constant 1 : i32
      %33 = vector.broadcast %c1_i32_14 : i32 to vector<4x4xi32>
      %34 = arith.addi %19, %33 : vector<4x4xi32>
      %35 = arith.cmpi eq, %18, %34 : vector<4x4xi32>
      %36 = arith.extui %35 : vector<4x4xi1> to vector<4x4xi32>
      %37 = arith.sitofp %36 : vector<4x4xi32> to vector<4x4xf32>
      %38 = vector.broadcast %16 : f32 to vector<4x4xf32>
      %39 = arith.mulf %38, %37 : vector<4x4xf32>
      %40 = arith.addf %32, %39 : vector<4x4xf32>
      %cst_15 = arith.constant dense<0.000000e+00> : vector<2x4xf32>
      %41 = tpu.matmul %13, %40, %cst_15 {dimension_numbers = #tpu.dot_dimension_numbers<[1], [0], [0], [1], [0, 0, 1, 1], [], []>, precision = #tpu.contract_precision<fp32>} : vector<2x4xf32>, vector<4x4xf32>, vector<2x4xf32> -> vector<2x4xf32>
      %42 = vector.broadcast %17 : f32 to vector<2x4xf32>
      %43 = arith.addf %41, %42 : vector<2x4xf32>
      %44 = arith.negf %43 : vector<2x4xf32>
      %45 = math.exp %44 : vector<2x4xf32>
      %cst_16 = arith.constant 1.000000e+00 : f32
      %46 = vector.broadcast %cst_16 : f32 to vector<2x4xf32>
      %47 = arith.addf %46, %45 : vector<2x4xf32>
      %48 = arith.divf %46, %47 : vector<2x4xf32>
      %c0_17 = arith.constant 0 : index
      %c0_18 = arith.constant 0 : index
      %49 = vector.load %arg5[%c0_17, %c0_18] : memref<2x4xf32, #tpu.memory_space<vmem>>, vector<2x4xf32>
      tpu.vector_store %arg5[%c0_17, %c0_18], %48 {strides = array<i32>} : memref<2x4xf32, #tpu.memory_space<vmem>>, vector<2x4xf32>,
    } else {
    }
    return
  }
  func.func @transform_0(%arg0: i32, %arg1: i32) -> i32 {
    %c0_i32 = arith.constant 0 : i32
    %c0_i32_0 = arith.constant 0 : i32
    return %c0_i32 : i32
  }
  func.func @transform_1(%arg0: i32, %arg1: i32) -> i32 {
    %c0_i32 = arith.constant 0 : i32
    %c0_i32_0 = arith.constant 0 : i32
    return %c0_i32 : i32
  }
  func.func @transform_2(%arg0: i32, %arg1: i32) -> (i32, i32, i32) {
    %c0_i32 = arith.constant 0 : i32
    %c0_i32_0 = arith.constant 0 : i32
    return %arg0, %c0_i32, %arg1 : i32, i32, i32
  }
  func.func @transform_3(%arg0: i32, %arg1: i32) -> (i32, i32) {
    %c0_i32 = arith.constant 0 : i32
    %c0_i32_0 = arith.constant 0 : i32
    return %arg0, %c0_i32 : i32, i32
  }
}

</mosaic_0001>

<bundles_post_ra>
// kernel: tpu_custom_call.1
= control target key start
LH: loop header
LB: loop body
LE: loop exit
PB: predicated region body
PF: predicated region fallthrough
CT: control target
= control target key end

     0   :  { %9 = vsyncpa [#allocation7], 0  ;;  %s815_s0 = inlined_call_operand.vmem [shape: f32[3], index: 0, kind: input, shape index: {}]   ;;  %s816_s1 = inlined_call_operand.<no memory space> [shape: f32[1], index: 1, kind: input, shape index: {}]   ;;  %s817_s2 = inlined_call_operand.hbm [shape: f32[2,4,256], index: 2, kind: input, shape index: {}]   ;;  %s818_s3 = inlined_call_operand.hbm [shape: f32[2,4], index: 3, kind: output, shape index: {}]  }
   0x1   :  { %10 = vsyncpa [#allocation5], 0 }
   0x2   :  { %11 = vsyncpa [#allocation6], 0  ;;  %s18_s14 = sshll.u32 %s815_s0, 4  ;;  %s19_s14 = int_to_ptr.vmem [resolvable:$true] %s18_s14 }
   0x3   :  { %s666_s15 = scalar_lea.vmem %s19_s14, 16  ;;  %p671_p1 = scmp.lt.s32.totalorder %s19_s14, %s19_s14 }
   0x4   :  { %p667_p0 = scmp.ne.s32.totalorder %s19_s14, %s666_s15  ;;  %p672_p2 = scmp.lt.s32.totalorder %s666_s15, %s666_s15 }
   0x6   :  { %p673_p3 = por %p672_p2, %p671_p1 }
   0x8   :  { %p674_p4 = pnand %p673_p3, %p667_p0 }
   0xa   :  { %677 = shalt.err (!%p674_p4)
}
   0xb   :  { %s728_s16 = smov [#allocation4]   ;;  %s729_s17 = smov [#allocation8]  }
   0xc   :  { %21 = dma.vmem_to_smem %s19_s14, 16, %s728_s16, [#allocation7]  }
   0xd   :  { %s29_s18 = sshll.u32 %s729_s17, 4  ;;  %s678_s21 = scalar_lea.hbm %s817_s2, 256  ;;  %s30_s18 = int_to_ptr.vmem [resolvable:$true] %s29_s18 }
   0xe   :  { %p679_p5 = scmp.ne.s32.totalorder %s817_s2, %s678_s21  ;;  %p682_p6 = scmp.lt.u32.totalorder %s678_s21, %s817_s2 }
  0x10   :  { %p684_p7 = pnand %p682_p6, %p679_p5 }
  0x12   :  { %687 = shalt.err (!%p684_p7)
}
  0x13   :  { %s688_s25 = scalar_lea.vmem %s30_s18, 256  ;;  %p693_p9 = scmp.lt.s32.totalorder %s30_s18, %s30_s18 }
  0x14   :  { %p689_p8 = scmp.ne.s32.totalorder %s30_s18, %s688_s25  ;;  %p694_p10 = scmp.lt.s32.totalorder %s688_s25, %s688_s25 }
  0x16   :  { %p695_p11 = por %p694_p10, %p693_p9 }
  0x18   :  { %p696_p12 = pnand %p695_p11, %p689_p8 }
  0x1a   :  { %699 = shalt.err (!%p696_p12)
}
  0x1b   :  { %s730_s26 = smov 128   ;;  %s731_s27 = smov 8  }
  0x1c   :  { %35 = dma.hbm_to_vmem [thread:$0]  %s817_s2, 256, %s30_s18, [#allocation5], %s730_s26, %s730_s26, %s731_s27  }
  0x1d   :  { %722 = dma.done.wait [#allocation7], 16  }
  0x1e   :  { %723 = vsyncadd [#allocation7], 4294967280 }
  0x1f   :  { %724 = dma.done.wait [#allocation5], 256  }
  0x20   :  { %725 = vsyncadd [#allocation5], 4294967040 }
  0x21   :  { %42 = sfence }
  0x22   :  { %v49_v0 = vld [vmem:[#allocation8] sm:$0xff]  ;;  %vm58_vm0 = vcmask 1043456   ;;  %v50_v1 = vld [vmem:[#allocation8 + $0x8] sm:$0xff]  ;;  %v71_v2 = vlaneseq  ;;  %vm47_vm1 = vcmask 25600   ;;  %v732_v14 = vmov 0.0   ;;  %s92_s2 = sld [smem:[#allocation4]] }
  0x23   :  { %v54_v3 = vcombine.high %v49_v0, %v49_v0  ;;  %v59_v4 = vsel %vm58_vm0, %v49_v0, 0.0  ;;  %v55_v5 = vcombine.high %v50_v1, %v50_v1  ;;  %v64_v9 = vsel %vm58_vm0, %v50_v1, 0.0  ;;  %48 = vst.msk [vmem:[#allocation2] sm:$0x3] %vm47_vm1, %v732_v14  ;;  %628 = vmatprep.subr.mxu0 %v732_v14  ;;  %613 = vmatprep.subr.mxu1 %v732_v14  ;;  %s594_s30 = sld [smem:[#allocation4 + $0x1]]  ;;  %s595_s4 = sld [smem:[#allocation4 + $0x2]] }
  0x24   :  { %v72_v6 = vand.u32 127, %v71_v2  ;;  %v74_v7 = vshrl.u32 %v71_v2, 7  ;;  %vm733_vm5 = vmmov 0   ;;  %vm81_vm6 = vcmask 1041409   ;;  %s734_s7 = smov [#allocation9]  }
  0x25   :  { %v60_v8 = vsel %vm58_vm0, %v54_v3, 0.0  ;;  %v65_v10 = vsel %vm58_vm0, %v55_v5, 0.0  ;;  %630 = vmatprep.mubr.msk.f32.mxu0 %vm733_vm5, %v732_v14  ;;  %615 = vmatprep.mubr.msk.f32.mxu1 %vm733_vm5, %v732_v14  ;;  %vm118_vm7 = vcmask 31744   ;;  %v117_v51 = vstv %s816_s1  ;;  %s584_s8 = sshll.u32 %s734_s7, 4  ;;  %s585_s8 = int_to_ptr.vmem [resolvable:$true] %s584_s8 }
  0x26   :  { %v61_v11 = vadd.f32 %v60_v8, %v59_v4  ;;  %v75_v12 = vsub.s32 %v72_v6, %v74_v7  ;;  %v66_v13 = vadd.f32 %v65_v10, %v64_v9  ;;  %v596_v15 = vadd.s32 4294967295, %v72_v6  ;;  %s700_s9 = scalar_lea.vmem %s585_s8, 32  ;;  %p705_p0 = scmp.lt.s32.totalorder %s585_s8, %s585_s8 }
  0x27   :  { %v110_v16 = vadd.s32 1, %v72_v6  ;;  %vm104_vm2 = vcmp.eq.s32.totalorder %v74_v7, %v72_v6  ;;  %p701_p13 = scmp.ne.s32.totalorder %s585_s8, %s700_s9  ;;  %p706_p1 = scmp.lt.s32.totalorder %s700_s9, %s700_s9 }
  0x28   :  { %62 = vadd.xlane.f32.xlu0 %v61_v11  ;;  %vm99_vm3 = vcmp.eq.s32.totalorder %v74_v7, %v596_v15  ;;  %v598_v18 = vsel %vm104_vm2, 1.0, %v732_v14  ;;  %v102_v20 = vstv %s92_s2 }
  0x29   :  { %vm111_vm4 = vcmp.eq.s32.totalorder %v74_v7, %v110_v16  ;;  %v597_v17 = vsel %vm99_vm3, 1.0, %v732_v14  ;;  %v107_v21 = vstv %s594_s30  ;;  %v114_v24 = vstv %s595_s4  ;;  %p707_p2 = por %p706_p1, %p705_p0 }
  0x2a   :  { %v599_v19 = vsel %vm111_vm4, 1.0, %v732_v14  ;;  %v103_v22 = vmul.f32 %v597_v17, %v102_v20  ;;  %v108_v23 = vmul.f32 %v598_v18, %v107_v21  ;;  %v51_v33 = vld [vmem:[#allocation2] sm:$0x3] }
  0x2b   :  { %v115_v25 = vmul.f32 %v599_v19, %v114_v24  ;;  %p708_p3 = pnand %p707_p2, %p701_p13 }
  0x2c   :  { %67 = vadd.xlane.f32.xlu0 %v66_v13  ;;  %v109_v26 = vadd.f32 %v108_v23, %v103_v22 }
  0x2e   :  { %v116_v27 = vadd.f32 %v115_v25, %v109_v26 }
  0x30   :  { %v123_v28 = vsel %vm58_vm0, %v116_v27, 0 }
  0x31   :  { %v126_v29 = vand.u32 4294901760, %v123_v28 }
  0x33   :  { %629 = vmatpush3.msra.mxu0 %v126_v29  ;;  %614 = vmatpush3.msra.mxu1 %v126_v29  ;;  %v203_v37 = vsub.f32 %v123_v28, %v126_v29 }
  0x34   :  { %618 = vmatprep.subr.mxu1 %v732_v14  ;;  %633 = vmatprep.subr.mxu0 %v732_v14 }
  0x35   :  { %v204_v41 = vand.u32 4294901760, %v203_v37 }
  0x37   :  { %v205_v44 = vsub.f32 %v203_v37, %v204_v41 }
  0x39   :  { %v206_v47 = vand.u32 4294901760, %v205_v44 }
  0xb5   :  { %v63_v30 = vpop.xlane.xlu0 %62 }
  0xb6   :  { %v76_v32 = vrot.slane %v63_v30, %v75_v12 }
  0xb9   :  { %v68_v31 = vpop.xlane.xlu0 %67 }
  0xba   :  { %v80_v34 = vrot.slane %v68_v31, %v75_v12 }
  0xbc   :  { %v82_v35 = vsel %vm81_vm6, %v80_v34, %v76_v32 }
  0xbd   :  { %v84_v36 = vadd.f32 %v82_v35, %v51_v33 }
  0xbf   :  { %86 = vst.msk [vmem:[#allocation2] sm:$0x3] %vm47_vm1, %v84_v36 }
  0xc6   :  { %v90_v38 = vld [vmem:[#allocation2] sm:$0x3] }
  0xc7   :  { %v91_v39 = vmul.f32 0.00390625, %v90_v38 }
  0xc9   :  { %v120_v40 = vsel %vm118_vm7, %v91_v39, 0 }
  0xca   :  { %v191_v42 = vand.u32 4294901760, %v120_v40 }
  0xcc   :  { %v192_v43 = vsub.f32 %v120_v40, %v191_v42 }
  0xce   :  { %v193_v45 = vand.u32 4294901760, %v192_v43 }
  0xd0   :  { %631 = vmatmul.mubr.f32.vlgmr.msra.gmra.mrb[0].mxu0 %v193_v45  ;;  %v194_v46 = vsub.f32 %v192_v43, %v193_v45 }
  0xd1   :  { %634 = vmatpush3.msra.mxu0 %v204_v41  ;;  %635 = vmatprep.mubr.msk.f32.mxu0 %vm733_vm5, %v732_v14 }
  0xd2   :  { %v195_v48 = vand.u32 4294901760, %v194_v46  ;;  %638 = vmatprep.subr.mxu0 %v732_v14 }
  0xd4   :  { %616 = vmatmul.mubr.f32.vlgmr.msra.gmra.mrb[0].mxu1 %v195_v48 }
  0xd5   :  { %619 = vmatpush3.msra.mxu1 %v206_v47  ;;  %620 = vmatprep.mubr.msk.f32.mxu1 %vm733_vm5, %v732_v14 }
  0xd6   :  { %623 = vmatprep.subr.mxu1 %v732_v14 }
  0xd8   :  { %636 = vmatmul.mubr.f32.vlgmr.msra.gmra.mrb[0].mxu0 %v191_v42 }
  0xd9   :  { %639 = vmatpush3.msra.mxu0 %v126_v29  ;;  %640 = vmatprep.mubr.msk.f32.mxu0 %vm733_vm5, %v732_v14 }
  0xdc   :  { %621 = vmatmul.mubr.f32.vlgmr.msra.gmra.mrb[0].mxu1 %v191_v42 }
  0xdd   :  { %624 = vmatpush3.msra.mxu1 %v203_v37  ;;  %625 = vmatprep.mubr.msk.f32.mxu1 %vm733_vm5, %v732_v14 }
  0xe0   :  { %641 = vmatmul.mubr.f32.vlgmr.msra.gmra.mrb[0].mxu0 %v191_v42 }
  0xe4   :  { %626 = vmatmul.mubr.f32.vlgmr.msra.gmra.mrb[0].mxu1 %v192_v43 }
 0x1b3   :  { %v567_v49 = vpop.f32.mrb[0].mxu0 }
 0x1b4   :  { %v642_v50 = vpop.f32.mrb[1].mxu0 }
 0x1b7   :  { %v347_v52 = vpop.f32.mrb[0].mxu1 }
 0x1b8   :  { %v643_v53 = vadd.f32 %v347_v52, %v117_v51  ;;  %v627_v54 = vpop.f32.mrb[1].mxu1 }
 0x1ba   :  { %v644_v55 = vadd.f32 %v643_v53, %v567_v49 }
 0x1bc   :  { %v600_v56 = vmul.f32 -1.442695, %v644_v55 }
 0x1be   :  { %662 = vpow2.f32 %v600_v56 }
 0x1c8   :  { %v663_v57 = vpop.eup %662 }
 0x1c9   :  { %v574_v58 = vadd.f32 1.0, %v663_v57 }
 0x1cb   :  { %664 = vrcp.f32 %v574_v58 }
 0x1d5   :  { %v665_v59 = vpop.eup %664 }
 0x1d6   :  { %577 = vst.msk [vmem:[#allocation9] sm:$0x3] %vm47_vm1, %v665_v59 }
 0x1d7   :  { %711 = shalt.err (!%p708_p3)
}
 0x1d8   :  { %s712_s11 = scalar_lea.hbm %s818_s3, 32 }
 0x1d9   :  { %p713_p4 = scmp.ne.s32.totalorder %s818_s3, %s712_s11  ;;  %p716_p5 = scmp.lt.u32.totalorder %s712_s11, %s818_s3 }
 0x1db   :  { %p718_p6 = pnand %p716_p5, %p713_p4 }
 0x1dd   :  { %721 = shalt.err (!%p718_p6)
}
 0x1de   :  { %587 = dma.vmem_to_hbm [thread:$0]  %s585_s8, 32, %s818_s3, [#allocation6]  }
 0x1df   :  { %726 = dma.done.wait [#allocation6], 32  }
 0x1e0   :  { %727 = vsyncadd [#allocation6], 4294967264 }
 0x1e1   :  { %591 = vsyncpa [#allocation5], 1 }
 0x1e2   :  { %592 = vsyncpa [#allocation6], 1 }
 0x1e3   :  { %593 = vsyncpa [#allocation7], 1 }

</bundles_post_ra>
